<compile_context>
chip_gen: v7x
topology: tpu7x:2x2x1
jax: 0.10.0
libtpu: 0.0.40
codegen_flags: <defaults>
</compile_context>

<pallas_src>
from math import sqrt

import numpy as np
import jax
import jax.numpy as jnp
from jax import lax
from jax.experimental import pallas as pl
from jax.experimental.pallas import tpu as pltpu  # noqa: F401  (single-block kernel: VMEM defaults suffice)

# Small, module-consistent shapes.
B, S, D = 2, 8, 32          # batch, seq, d_model
H = 4                       # attention heads
DH = D // H                 # head dim
DFF = 64                    # feed-forward hidden dim
BS = B * S                  # tokens handled per (single) kernel invocation
EPS = 1e-5                  # nn.LayerNorm default eps

# Row indices inside the packed [8, 128] vector slab.
(R_LN1_G, R_LN1_B, R_BQKV, R_BO, R_LN2_G, R_LN2_B, R_B1, R_B2) = range(8)
VEC_PAD = 128


def _layer_norm(x, g, b):
    mu = jnp.mean(x, axis=-1, keepdims=True)
    var = jnp.mean((x - mu) ** 2, axis=-1, keepdims=True)
    return (x - mu) * jax.lax.rsqrt(var + EPS) * g + b


def encoder_layer_kernel(x_ref, wqkv_ref, wo_ref, w1_ref, w2_ref, vec_ref,
                         mask_ref, out_ref):
    x = x_ref[...]                                                    # [BS, D] f32

    # ---- sublayer 1: pre-norm + multi-head self-attention + residual ----
    ln1 = _layer_norm(x, vec_ref[R_LN1_G:R_LN1_G + 1, :D],
                      vec_ref[R_LN1_B:R_LN1_B + 1, :D])

    # Fused Q|K|V projection: one MXU push instead of 12 tiny per-head dots.
    # 1/sqrt(DH) is already folded into the Q columns / Q bias wrapper-side.
    qkv = jnp.dot(ln1, wqkv_ref[...], preferred_element_type=jnp.float32) \
        + vec_ref[R_BQKV:R_BQKV + 1, :3 * D]                          # [BS, 3D]

    # Static block-diagonal additive mask ([BS, BS], host-built constant):
    # tokens only attend within their own batch element.
    mask = mask_ref[...]

    heads = []
    for h in range(H):                                # static unroll over heads
        c0 = h * DH
        qh = qkv[:, c0:c0 + DH]
        kh = qkv[:, D + c0:D + c0 + DH]
        vh = qkv[:, 2 * D + c0:2 * D + c0 + DH]
        # Contract dim 1 of both operands (trans_b form): no explicit kh.T.
        scores = lax.dot_general(qh, kh, (((1,), (1,)), ((), ())),
                                 preferred_element_type=jnp.float32) + mask
        scores = scores - jnp.max(scores, axis=-1, keepdims=True)
        p = jnp.exp(scores)
        p = p * pl.reciprocal(jnp.sum(p, axis=-1, keepdims=True), approx=True)
        heads.append(jnp.dot(p, vh, preferred_element_type=jnp.float32))  # [BS, DH]

    # One output projection over the lane-concatenated heads (single K=32
    # matmul; cheaper than 4 accumulating K=8 matmuls on MRF chips).
    attn = jnp.concatenate(heads, axis=-1)                            # [BS, D]
    # TODO(synk): nn.Dropout is stochastic in train mode; identity here (eval).
    out1 = jnp.dot(attn, wo_ref[...], preferred_element_type=jnp.float32) \
        + vec_ref[R_BO:R_BO + 1, :D] + x

    # ---- sublayer 2: pre-norm + position-wise feed-forward + residual ----
    ln2 = _layer_norm(out1, vec_ref[R_LN2_G:R_LN2_G + 1, :D],
                      vec_ref[R_LN2_B:R_LN2_B + 1, :D])
    hid = jnp.dot(ln2, w1_ref[...], preferred_element_type=jnp.float32) \
        + vec_ref[R_B1:R_B1 + 1, :DFF]
    hid = jnp.maximum(hid, 0.0)                                       # ReLU
    ff = jnp.dot(hid, w2_ref[...], preferred_element_type=jnp.float32) \
        + vec_ref[R_B2:R_B2 + 1, :D]

    out_ref[...] = (ff + out1).astype(out_ref.dtype)


def init_params(key):
    ks = jax.random.split(key, 8)

    def lin(k, fan_in, fan_out):
        lim = 1.0 / sqrt(fan_in)
        w = jax.random.uniform(k, (fan_in, fan_out), jnp.float32, -lim, lim)
        b = jnp.zeros((1, fan_out), jnp.float32)
        return w, b

    wq, bq = lin(ks[0], D, D)
    wk, bk = lin(ks[1], D, D)
    wv, bv = lin(ks[2], D, D)
    wo, bo = lin(ks[3], D, D)
    w1, b1 = lin(ks[4], D, DFF)
    w2, b2 = lin(ks[5], DFF, D)
    ln1_g = jnp.ones((1, D), jnp.float32)
    ln1_b = jnp.zeros((1, D), jnp.float32)
    ln2_g = jnp.ones((1, D), jnp.float32)
    ln2_b = jnp.zeros((1, D), jnp.float32)
    return dict(ln1_g=ln1_g, ln1_b=ln1_b, wq=wq, bq=bq, wk=wk, bk=bk,
                wv=wv, bv=bv, wo=wo, bo=bo, ln2_g=ln2_g, ln2_b=ln2_b,
                w1=w1, b1=b1, w2=w2, b2=b2)


def _pad_row(v, n=VEC_PAD):
    v = jnp.asarray(v).reshape(-1).astype(jnp.float32)
    return jnp.pad(v, (0, n - v.shape[0]))


def pack_params(p):
    """One-time (init-time) packing of parameters into kernel operands.

    Hoisted out of the per-call path so the per-call glue is just the
    pallas_call itself.
    """
    scale = 1.0 / sqrt(DH)
    # Fold the attention scale into the query projection (exact semantics).
    wqkv = jnp.concatenate([p["wq"] * scale, p["wk"], p["wv"]], axis=1)   # [D, 3D]
    # Single fused qkv bias row matching the wqkv column order.
    bqkv = jnp.concatenate(
        [p["bq"].reshape(-1) * scale, p["bk"].reshape(-1), p["bv"].reshape(-1)])
    # Pack the small vectors into one lane-padded [8, 128] slab (row order = R_*).
    vecs = jnp.stack([
        _pad_row(p["ln1_g"]), _pad_row(p["ln1_b"]),
        _pad_row(bqkv),
        _pad_row(p["bo"]),
        _pad_row(p["ln2_g"]), _pad_row(p["ln2_b"]),
        _pad_row(p["b1"]), _pad_row(p["b2"]),
    ])                                                                    # [8, 128]

    # Static block-diagonal additive mask, built host-side with numpy.
    row_b = np.arange(BS)[:, None] // S
    col_b = np.arange(BS)[None, :] // S
    mask = jnp.asarray(np.where(row_b == col_b, 0.0, -1e30), dtype=jnp.float32)

    return dict(wqkv=wqkv, wo=p["wo"], w1=p["w1"], w2=p["w2"],
                vecs=vecs, mask=mask)


@jax.jit
def encoder_layer(x, packed):
    x2d = x.reshape(BS, D)
    out2d = pl.pallas_call(
        encoder_layer_kernel,
        out_shape=jax.ShapeDtypeStruct((BS, D), x.dtype),
        # No grid / no BlockSpecs: single invocation, every operand resident
        # in VMEM as a whole block (total footprint < 20 KB).
    )(x2d, packed["wqkv"], packed["wo"], packed["w1"], packed["w2"],
      packed["vecs"], packed["mask"])
    return out2d.reshape(B, S, D)


def encoder_layer_ref(x, p):
    """Pure-JAX reference for correctness checking."""
    def ln(v, g, b):
        mu = jnp.mean(v, -1, keepdims=True)
        var = jnp.mean((v - mu) ** 2, -1, keepdims=True)
        return (v - mu) / jnp.sqrt(var + EPS) * g[0] + b[0]

    ln1 = ln(x, p["ln1_g"], p["ln1_b"])
    q = ln1 @ p["wq"] + p["bq"][0]
    k = ln1 @ p["wk"] + p["bk"][0]
    v = ln1 @ p["wv"] + p["bv"][0]
    qh = q.reshape(B, S, H, DH).transpose(0, 2, 1, 3)
    kh = k.reshape(B, S, H, DH).transpose(0, 2, 1, 3)
    vh = v.reshape(B, S, H, DH).transpose(0, 2, 1, 3)
    sc = jnp.einsum("bhqd,bhkd->bhqk", qh, kh) / sqrt(DH)
    pr = jax.nn.softmax(sc, axis=-1)
    o = jnp.einsum("bhqk,bhkd->bhqd", pr, vh).transpose(0, 2, 1, 3).reshape(B, S, D)
    out1 = o @ p["wo"] + p["bo"][0] + x
    ln2 = ln(out1, p["ln2_g"], p["ln2_b"])
    ff = jnp.maximum(ln2 @ p["w1"] + p["b1"][0], 0.0) @ p["w2"] + p["b2"][0]
    return ff + out1


if __name__ == "__main__":
    key = jax.random.PRNGKey(0)
    kx, kp = jax.random.split(key)
    x = jax.random.normal(kx, (B, S, D), jnp.float32)
    params = init_params(kp)

    # Parameter packing happens once, outside the per-call path.
    packed = pack_params(params)
    packed = jax.tree_util.tree_map(jax.block_until_ready, packed)

    out = encoder_layer(x, packed)
    jax.block_until_ready(out)

    ref = encoder_layer_ref(x, params)
    assert out.shape == (B, S, D)
    # Tolerance widened (approx EUP reciprocal in softmax -> ~1e-3 deviations).
    assert jnp.allclose(out, ref, atol=5e-3, rtol=5e-3), \
        f"max abs err = {jnp.max(jnp.abs(out - ref))}"
    print("KERNEL_OK")
</pallas_src>

<mosaic_0001>
module attributes {stable_mosaic.version = 11 : i64} {
  func.func @encoder_layer_kernel(%arg0: memref<16x32xf32, #tpu.memory_space<vmem>>, %arg1: memref<32x96xf32, #tpu.memory_space<vmem>>, %arg2: memref<32x32xf32, #tpu.memory_space<vmem>>, %arg3: memref<32x64xf32, #tpu.memory_space<vmem>>, %arg4: memref<64x32xf32, #tpu.memory_space<vmem>>, %arg5: memref<8x128xf32, #tpu.memory_space<vmem>>, %arg6: memref<16x16xf32, #tpu.memory_space<vmem>>, %arg7: memref<16x32xf32, #tpu.memory_space<vmem>>) attributes {dimension_semantics = [], scalar_prefetch = 0 : i64, scratch_operands = 0 : i64, tpu.core_type = #tpu.core_type<tc>} {
    %c0 = arith.constant 0 : index
    %c0_0 = arith.constant 0 : index
    %0 = vector.load %arg0[%c0, %c0_0] : memref<16x32xf32, #tpu.memory_space<vmem>>, vector<16x32xf32>
    %c0_1 = arith.constant 0 : index
    %c0_2 = arith.constant 0 : index
    %1 = vector.load %arg5[%c0_1, %c0_2] : memref<8x128xf32, #tpu.memory_space<vmem>>, vector<1x32xf32>
    %c1 = arith.constant 1 : index
    %c0_3 = arith.constant 0 : index
    %2 = vector.load %arg5[%c1, %c0_3] : memref<8x128xf32, #tpu.memory_space<vmem>>, vector<1x32xf32>
    %cst = arith.constant dense<0.000000e+00> : vector<16xf32>
    %3 = vector.multi_reduction <add>, %0, %cst [1] : vector<16x32xf32> to vector<16xf32>
    %4 = vector.shape_cast %3 : vector<16xf32> to vector<16x1xf32>
    %cst_4 = arith.constant 3.200000e+01 : f32
    %5 = vector.broadcast %cst_4 : f32 to vector<16x1xf32>
    %6 = arith.divf %4, %5 : vector<16x1xf32>
    %7 = vector.broadcast %6 : vector<16x1xf32> to vector<16x32xf32>
    %8 = arith.subf %0, %7 : vector<16x32xf32>
    %9 = arith.mulf %8, %8 : vector<16x32xf32>
    %cst_5 = arith.constant dense<0.000000e+00> : vector<16xf32>
    %10 = vector.multi_reduction <add>, %9, %cst_5 [1] : vector<16x32xf32> to vector<16xf32>
    %11 = vector.shape_cast %10 : vector<16xf32> to vector<16x1xf32>
    %cst_6 = arith.constant 3.200000e+01 : f32
    %12 = vector.broadcast %cst_6 : f32 to vector<16x1xf32>
    %13 = arith.divf %11, %12 : vector<16x1xf32>
    %14 = vector.broadcast %6 : vector<16x1xf32> to vector<16x32xf32>
    %15 = arith.subf %0, %14 : vector<16x32xf32>
    %cst_7 = arith.constant 9.99999974E-6 : f32
    %16 = vector.broadcast %cst_7 : f32 to vector<16x1xf32>
    %17 = arith.addf %13, %16 : vector<16x1xf32>
    %18 = math.rsqrt %17 : vector<16x1xf32>
    %19 = vector.broadcast %18 : vector<16x1xf32> to vector<16x32xf32>
    %20 = arith.mulf %15, %19 : vector<16x32xf32>
    %21 = vector.broadcast %1 : vector<1x32xf32> to vector<16x32xf32>
    %22 = arith.mulf %20, %21 : vector<16x32xf32>
    %23 = vector.broadcast %2 : vector<1x32xf32> to vector<16x32xf32>
    %24 = arith.addf %22, %23 : vector<16x32xf32>
    %c0_8 = arith.constant 0 : index
    %c0_9 = arith.constant 0 : index
    %25 = vector.load %arg1[%c0_8, %c0_9] : memref<32x96xf32, #tpu.memory_space<vmem>>, vector<32x96xf32>
    %cst_10 = arith.constant dense<0.000000e+00> : vector<16x96xf32>
    %26 = tpu.matmul %24, %25, %cst_10 {dimension_numbers = #tpu.dot_dimension_numbers<[1], [0], [0], [1], [0, 0, 1, 1], [], []>} : vector<16x32xf32>, vector<32x96xf32>, vector<16x96xf32> -> vector<16x96xf32>
    %c2 = arith.constant 2 : index
    %c0_11 = arith.constant 0 : index
    %27 = vector.load %arg5[%c2, %c0_11] : memref<8x128xf32, #tpu.memory_space<vmem>>, vector<1x96xf32>
    %28 = vector.broadcast %27 : vector<1x96xf32> to vector<16x96xf32>
    %29 = arith.addf %26, %28 : vector<16x96xf32>
    %c0_12 = arith.constant 0 : index
    %c0_13 = arith.constant 0 : index
    %30 = vector.load %arg6[%c0_12, %c0_13] : memref<16x16xf32, #tpu.memory_space<vmem>>, vector<16x16xf32>
    %31 = vector.extract_strided_slice %29 {offsets = [0, 0], sizes = [16, 8], strides = [1, 1]} : vector<16x96xf32> to vector<16x8xf32>
    %32 = vector.extract_strided_slice %29 {offsets = [0, 32], sizes = [16, 8], strides = [1, 1]} : vector<16x96xf32> to vector<16x8xf32>
    %33 = vector.extract_strided_slice %29 {offsets = [0, 64], sizes = [16, 8], strides = [1, 1]} : vector<16x96xf32> to vector<16x8xf32>
    %cst_14 = arith.constant dense<0.000000e+00> : vector<16x16xf32>
    %34 = tpu.matmul %31, %32, %cst_14 {dimension_numbers = #tpu.dot_dimension_numbers<[1], [1], [0], [0], [0, 0, 1, 0], [], []>} : vector<16x8xf32>, vector<16x8xf32>, vector<16x16xf32> -> vector<16x16xf32>
    %35 = arith.addf %34, %30 : vector<16x16xf32>
    %cst_15 = arith.constant dense<0xFF800000> : vector<16xf32>
    %36 = vector.multi_reduction <maximumf>, %35, %cst_15 [1] : vector<16x16xf32> to vector<16xf32>
    %37 = vector.shape_cast %36 : vector<16xf32> to vector<16x1xf32>
    %38 = vector.broadcast %37 : vector<16x1xf32> to vector<16x16xf32>
    %39 = arith.subf %35, %38 : vector<16x16xf32>
    %40 = math.exp %39 : vector<16x16xf32>
    %cst_16 = arith.constant dense<0.000000e+00> : vector<16xf32>
    %41 = vector.multi_reduction <add>, %40, %cst_16 [1] : vector<16x16xf32> to vector<16xf32>
    %42 = vector.shape_cast %41 : vector<16xf32> to vector<16x1xf32>
    %43 = tpu.reciprocal %42 {approx = true} : vector<16x1xf32> -> vector<16x1xf32>
    %44 = vector.broadcast %43 : vector<16x1xf32> to vector<16x16xf32>
    %45 = arith.mulf %40, %44 : vector<16x16xf32>
    %cst_17 = arith.constant dense<0.000000e+00> : vector<16x8xf32>
    %46 = tpu.matmul %45, %33, %cst_17 {dimension_numbers = #tpu.dot_dimension_numbers<[1], [0], [0], [1], [0, 0, 1, 1], [], []>} : vector<16x16xf32>, vector<16x8xf32>, vector<16x8xf32> -> vector<16x8xf32>
    %47 = vector.extract_strided_slice %29 {offsets = [0, 8], sizes = [16, 8], strides = [1, 1]} : vector<16x96xf32> to vector<16x8xf32>
    %48 = vector.extract_strided_slice %29 {offsets = [0, 40], sizes = [16, 8], strides = [1, 1]} : vector<16x96xf32> to vector<16x8xf32>
    %49 = vector.extract_strided_slice %29 {offsets = [0, 72], sizes = [16, 8], strides = [1, 1]} : vector<16x96xf32> to vector<16x8xf32>
    %cst_18 = arith.constant dense<0.000000e+00> : vector<16x16xf32>
    %50 = tpu.matmul %47, %48, %cst_18 {dimension_numbers = #tpu.dot_dimension_numbers<[1], [1], [0], [0], [0, 0, 1, 0], [], []>} : vector<16x8xf32>, vector<16x8xf32>, vector<16x16xf32> -> vector<16x16xf32>
    %51 = arith.addf %50, %30 : vector<16x16xf32>
    %cst_19 = arith.constant dense<0xFF800000> : vector<16xf32>
    %52 = vector.multi_reduction <maximumf>, %51, %cst_19 [1] : vector<16x16xf32> to vector<16xf32>
    %53 = vector.shape_cast %52 : vector<16xf32> to vector<16x1xf32>
    %54 = vector.broadcast %53 : vector<16x1xf32> to vector<16x16xf32>
    %55 = arith.subf %51, %54 : vector<16x16xf32>
    %56 = math.exp %55 : vector<16x16xf32>
    %cst_20 = arith.constant dense<0.000000e+00> : vector<16xf32>
    %57 = vector.multi_reduction <add>, %56, %cst_20 [1] : vector<16x16xf32> to vector<16xf32>
    %58 = vector.shape_cast %57 : vector<16xf32> to vector<16x1xf32>
    %59 = tpu.reciprocal %58 {approx = true} : vector<16x1xf32> -> vector<16x1xf32>
    %60 = vector.broadcast %59 : vector<16x1xf32> to vector<16x16xf32>
    %61 = arith.mulf %56, %60 : vector<16x16xf32>
    %cst_21 = arith.constant dense<0.000000e+00> : vector<16x8xf32>
    %62 = tpu.matmul %61, %49, %cst_21 {dimension_numbers = #tpu.dot_dimension_numbers<[1], [0], [0], [1], [0, 0, 1, 1], [], []>} : vector<16x16xf32>, vector<16x8xf32>, vector<16x8xf32> -> vector<16x8xf32>
    %63 = vector.extract_strided_slice %29 {offsets = [0, 16], sizes = [16, 8], strides = [1, 1]} : vector<16x96xf32> to vector<16x8xf32>
    %64 = vector.extract_strided_slice %29 {offsets = [0, 48], sizes = [16, 8], strides = [1, 1]} : vector<16x96xf32> to vector<16x8xf32>
    %65 = vector.extract_strided_slice %29 {offsets = [0, 80], sizes = [16, 8], strides = [1, 1]} : vector<16x96xf32> to vector<16x8xf32>
    %cst_22 = arith.constant dense<0.000000e+00> : vector<16x16xf32>
    %66 = tpu.matmul %63, %64, %cst_22 {dimension_numbers = #tpu.dot_dimension_numbers<[1], [1], [0], [0], [0, 0, 1, 0], [], []>} : vector<16x8xf32>, vector<16x8xf32>, vector<16x16xf32> -> vector<16x16xf32>
    %67 = arith.addf %66, %30 : vector<16x16xf32>
    %cst_23 = arith.constant dense<0xFF800000> : vector<16xf32>
    %68 = vector.multi_reduction <maximumf>, %67, %cst_23 [1] : vector<16x16xf32> to vector<16xf32>
    %69 = vector.shape_cast %68 : vector<16xf32> to vector<16x1xf32>
    %70 = vector.broadcast %69 : vector<16x1xf32> to vector<16x16xf32>
    %71 = arith.subf %67, %70 : vector<16x16xf32>
    %72 = math.exp %71 : vector<16x16xf32>
    %cst_24 = arith.constant dense<0.000000e+00> : vector<16xf32>
    %73 = vector.multi_reduction <add>, %72, %cst_24 [1] : vector<16x16xf32> to vector<16xf32>
    %74 = vector.shape_cast %73 : vector<16xf32> to vector<16x1xf32>
    %75 = tpu.reciprocal %74 {approx = true} : vector<16x1xf32> -> vector<16x1xf32>
    %76 = vector.broadcast %75 : vector<16x1xf32> to vector<16x16xf32>
    %77 = arith.mulf %72, %76 : vector<16x16xf32>
    %cst_25 = arith.constant dense<0.000000e+00> : vector<16x8xf32>
    %78 = tpu.matmul %77, %65, %cst_25 {dimension_numbers = #tpu.dot_dimension_numbers<[1], [0], [0], [1], [0, 0, 1, 1], [], []>} : vector<16x16xf32>, vector<16x8xf32>, vector<16x8xf32> -> vector<16x8xf32>
    %79 = vector.extract_strided_slice %29 {offsets = [0, 24], sizes = [16, 8], strides = [1, 1]} : vector<16x96xf32> to vector<16x8xf32>
    %80 = vector.extract_strided_slice %29 {offsets = [0, 56], sizes = [16, 8], strides = [1, 1]} : vector<16x96xf32> to vector<16x8xf32>
    %81 = vector.extract_strided_slice %29 {offsets = [0, 88], sizes = [16, 8], strides = [1, 1]} : vector<16x96xf32> to vector<16x8xf32>
    %cst_26 = arith.constant dense<0.000000e+00> : vector<16x16xf32>
    %82 = tpu.matmul %79, %80, %cst_26 {dimension_numbers = #tpu.dot_dimension_numbers<[1], [1], [0], [0], [0, 0, 1, 0], [], []>} : vector<16x8xf32>, vector<16x8xf32>, vector<16x16xf32> -> vector<16x16xf32>
    %83 = arith.addf %82, %30 : vector<16x16xf32>
    %cst_27 = arith.constant dense<0xFF800000> : vector<16xf32>
    %84 = vector.multi_reduction <maximumf>, %83, %cst_27 [1] : vector<16x16xf32> to vector<16xf32>
    %85 = vector.shape_cast %84 : vector<16xf32> to vector<16x1xf32>
    %86 = vector.broadcast %85 : vector<16x1xf32> to vector<16x16xf32>
    %87 = arith.subf %83, %86 : vector<16x16xf32>
    %88 = math.exp %87 : vector<16x16xf32>
    %cst_28 = arith.constant dense<0.000000e+00> : vector<16xf32>
    %89 = vector.multi_reduction <add>, %88, %cst_28 [1] : vector<16x16xf32> to vector<16xf32>
    %90 = vector.shape_cast %89 : vector<16xf32> to vector<16x1xf32>
    %91 = tpu.reciprocal %90 {approx = true} : vector<16x1xf32> -> vector<16x1xf32>
    %92 = vector.broadcast %91 : vector<16x1xf32> to vector<16x16xf32>
    %93 = arith.mulf %88, %92 : vector<16x16xf32>
    %cst_29 = arith.constant dense<0.000000e+00> : vector<16x8xf32>
    %94 = tpu.matmul %93, %81, %cst_29 {dimension_numbers = #tpu.dot_dimension_numbers<[1], [0], [0], [1], [0, 0, 1, 1], [], []>} : vector<16x16xf32>, vector<16x8xf32>, vector<16x8xf32> -> vector<16x8xf32>
    %95 = tpu.concatenate %46, %62, %78, %94 in 1 : vector<16x8xf32>, vector<16x8xf32>, vector<16x8xf32>, vector<16x8xf32> -> vector<16x32xf32>
    %c0_30 = arith.constant 0 : index
    %c0_31 = arith.constant 0 : index
    %96 = vector.load %arg2[%c0_30, %c0_31] : memref<32x32xf32, #tpu.memory_space<vmem>>, vector<32x32xf32>
    %cst_32 = arith.constant dense<0.000000e+00> : vector<16x32xf32>
    %97 = tpu.matmul %95, %96, %cst_32 {dimension_numbers = #tpu.dot_dimension_numbers<[1], [0], [0], [1], [0, 0, 1, 1], [], []>} : vector<16x32xf32>, vector<32x32xf32>, vector<16x32xf32> -> vector<16x32xf32>
    %c3 = arith.constant 3 : index
    %c0_33 = arith.constant 0 : index
    %98 = vector.load %arg5[%c3, %c0_33] : memref<8x128xf32, #tpu.memory_space<vmem>>, vector<1x32xf32>
    %99 = vector.broadcast %98 : vector<1x32xf32> to vector<16x32xf32>
    %100 = arith.addf %97, %99 : vector<16x32xf32>
    %101 = arith.addf %100, %0 : vector<16x32xf32>
    %c4 = arith.constant 4 : index
    %c0_34 = arith.constant 0 : index
    %102 = vector.load %arg5[%c4, %c0_34] : memref<8x128xf32, #tpu.memory_space<vmem>>, vector<1x32xf32>
    %c5 = arith.constant 5 : index
    %c0_35 = arith.constant 0 : index
    %103 = vector.load %arg5[%c5, %c0_35] : memref<8x128xf32, #tpu.memory_space<vmem>>, vector<1x32xf32>
    %cst_36 = arith.constant dense<0.000000e+00> : vector<16xf32>
    %104 = vector.multi_reduction <add>, %101, %cst_36 [1] : vector<16x32xf32> to vector<16xf32>
    %105 = vector.shape_cast %104 : vector<16xf32> to vector<16x1xf32>
    %cst_37 = arith.constant 3.200000e+01 : f32
    %106 = vector.broadcast %cst_37 : f32 to vector<16x1xf32>
    %107 = arith.divf %105, %106 : vector<16x1xf32>
    %108 = vector.broadcast %107 : vector<16x1xf32> to vector<16x32xf32>
    %109 = arith.subf %101, %108 : vector<16x32xf32>
    %110 = arith.mulf %109, %109 : vector<16x32xf32>
    %cst_38 = arith.constant dense<0.000000e+00> : vector<16xf32>
    %111 = vector.multi_reduction <add>, %110, %cst_38 [1] : vector<16x32xf32> to vector<16xf32>
    %112 = vector.shape_cast %111 : vector<16xf32> to vector<16x1xf32>
    %cst_39 = arith.constant 3.200000e+01 : f32
    %113 = vector.broadcast %cst_39 : f32 to vector<16x1xf32>
    %114 = arith.divf %112, %113 : vector<16x1xf32>
    %115 = vector.broadcast %107 : vector<16x1xf32> to vector<16x32xf32>
    %116 = arith.subf %101, %115 : vector<16x32xf32>
    %cst_40 = arith.constant 9.99999974E-6 : f32
    %117 = vector.broadcast %cst_40 : f32 to vector<16x1xf32>
    %118 = arith.addf %114, %117 : vector<16x1xf32>
    %119 = math.rsqrt %118 : vector<16x1xf32>
    %120 = vector.broadcast %119 : vector<16x1xf32> to vector<16x32xf32>
    %121 = arith.mulf %116, %120 : vector<16x32xf32>
    %122 = vector.broadcast %102 : vector<1x32xf32> to vector<16x32xf32>
    %123 = arith.mulf %121, %122 : vector<16x32xf32>
    %124 = vector.broadcast %103 : vector<1x32xf32> to vector<16x32xf32>
    %125 = arith.addf %123, %124 : vector<16x32xf32>
    %c0_41 = arith.constant 0 : index
    %c0_42 = arith.constant 0 : index
    %126 = vector.load %arg3[%c0_41, %c0_42] : memref<32x64xf32, #tpu.memory_space<vmem>>, vector<32x64xf32>
    %cst_43 = arith.constant dense<0.000000e+00> : vector<16x64xf32>
    %127 = tpu.matmul %125, %126, %cst_43 {dimension_numbers = #tpu.dot_dimension_numbers<[1], [0], [0], [1], [0, 0, 1, 1], [], []>} : vector<16x32xf32>, vector<32x64xf32>, vector<16x64xf32> -> vector<16x64xf32>
    %c6 = arith.constant 6 : index
    %c0_44 = arith.constant 0 : index
    %128 = vector.load %arg5[%c6, %c0_44] : memref<8x128xf32, #tpu.memory_space<vmem>>, vector<1x64xf32>
    %129 = vector.broadcast %128 : vector<1x64xf32> to vector<16x64xf32>
    %130 = arith.addf %127, %129 : vector<16x64xf32>
    %cst_45 = arith.constant 0.000000e+00 : f32
    %131 = vector.broadcast %cst_45 : f32 to vector<16x64xf32>
    %132 = arith.maximumf %130, %131 : vector<16x64xf32>
    %c0_46 = arith.constant 0 : index
    %c0_47 = arith.constant 0 : index
    %133 = vector.load %arg4[%c0_46, %c0_47] : memref<64x32xf32, #tpu.memory_space<vmem>>, vector<64x32xf32>
    %cst_48 = arith.constant dense<0.000000e+00> : vector<16x32xf32>
    %134 = tpu.matmul %132, %133, %cst_48 {dimension_numbers = #tpu.dot_dimension_numbers<[1], [0], [0], [1], [0, 0, 1, 1], [], []>} : vector<16x64xf32>, vector<64x32xf32>, vector<16x32xf32> -> vector<16x32xf32>
    %c7 = arith.constant 7 : index
    %c0_49 = arith.constant 0 : index
    %135 = vector.load %arg5[%c7, %c0_49] : memref<8x128xf32, #tpu.memory_space<vmem>>, vector<1x32xf32>
    %136 = vector.broadcast %135 : vector<1x32xf32> to vector<16x32xf32>
    %137 = arith.addf %134, %136 : vector<16x32xf32>
    %138 = arith.addf %137, %101 : vector<16x32xf32>
    %c0_50 = arith.constant 0 : index
    %c0_51 = arith.constant 0 : index
    %139 = vector.load %arg7[%c0_50, %c0_51] : memref<16x32xf32, #tpu.memory_space<vmem>>, vector<16x32xf32>
    tpu.vector_store %arg7[%c0_50, %c0_51], %138 {strides = array<i32>} : memref<16x32xf32, #tpu.memory_space<vmem>>, vector<16x32xf32>,
    return
  }
}

</mosaic_0001>

<bundles_post_ra>
// kernel: encoder_layer.1
= control target key start
LH: loop header
LB: loop body
LE: loop exit
PB: predicated region body
PF: predicated region fallthrough
CT: control target
= control target key end

     0   :  { %12 = vsyncpa [#allocation3], 0  ;;  %s2152_s0 = inlined_call_operand.hbm [shape: f32[16,32], index: 0, kind: input, shape index: {}]   ;;  %s2153_s1 = inlined_call_operand.vmem [shape: f32[32,96], index: 1, kind: input, shape index: {}]   ;;  %s2154_s2 = inlined_call_operand.vmem [shape: f32[32,32], index: 2, kind: input, shape index: {}]   ;;  %s2155_s3 = inlined_call_operand.vmem [shape: f32[32,64], index: 3, kind: input, shape index: {}]   ;;  %s2156_s4 = inlined_call_operand.vmem [shape: f32[64,32], index: 4, kind: input, shape index: {}]   ;;  %s2157_s5 = inlined_call_operand.vmem [shape: f32[8,128], index: 5, kind: input, shape index: {}]   ;;  %s2158_s6 = inlined_call_operand.hbm [shape: f32[16,16], index: 6, kind: input, shape index: {}]   ;;  %s2159_s7 = inlined_call_operand.hbm [shape: f32[16,32], index: 7, kind: output, shape index: {}]  }
   0x1   :  { %13 = vsyncpa [#allocation6], 0 }
   0x2   :  { %14 = vsyncpa [#allocation4], 0  ;;  %s1821_s24 = smov [#allocation2]   ;;  %s1749_s28 = scalar_lea.hbm %s2152_s0, 256 }
   0x3   :  { %s20_s25 = sshll.u32 %s1821_s24, 4  ;;  %p1750_p0 = scmp.ne.s32.totalorder %s2152_s0, %s1749_s28  ;;  %s21_s25 = int_to_ptr.vmem [resolvable:$true] %s20_s25 }
   0x4   :  { %p1753_p1 = scmp.lt.u32.totalorder %s1749_s28, %s2152_s0 }
   0x6   :  { %p1755_p2 = pnand %p1753_p1, %p1750_p0 }
   0x8   :  { %1758 = shalt.err (!%p1755_p2)
}
   0x9   :  { %s1759_s10 = scalar_lea.vmem %s21_s25, 256  ;;  %p1764_p4 = scmp.lt.s32.totalorder %s21_s25, %s21_s25 }
   0xa   :  { %p1760_p3 = scmp.ne.s32.totalorder %s21_s25, %s1759_s10  ;;  %p1765_p5 = scmp.lt.s32.totalorder %s1759_s10, %s1759_s10 }
   0xc   :  { %p1766_p6 = por %p1765_p5, %p1764_p4 }
   0xe   :  { %p1767_p7 = pnand %p1766_p6, %p1760_p3 }
  0x10   :  { %1770 = shalt.err (!%p1767_p7)
}
  0x11   :  { %s1822_s11 = smov 128   ;;  %s1823_s12 = smov 8  }
  0x12   :  { %26 = dma.hbm_to_vmem [thread:$0]  %s2152_s0, 256, %s21_s25, [#allocation3], %s1822_s11, %s1822_s11, %s1823_s12  }
  0x13   :  { %s1824_s15 = smov [#allocation5]   ;;  %s1771_s19 = scalar_lea.hbm %s2158_s6, 256 }
  0x14   :  { %s42_s16 = sshll.u32 %s1824_s15, 4  ;;  %p1772_p8 = scmp.ne.s32.totalorder %s2158_s6, %s1771_s19  ;;  %s43_s16 = int_to_ptr.vmem [resolvable:$true] %s42_s16 }
  0x15   :  { %p1775_p9 = scmp.lt.u32.totalorder %s1771_s19, %s2158_s6 }
  0x17   :  { %p1777_p10 = pnand %p1775_p9, %p1772_p8 }
  0x19   :  { %1780 = shalt.err (!%p1777_p10)
}
  0x1a   :  { %s1781_s24 = scalar_lea.vmem %s43_s16, 256  ;;  %p1786_p12 = scmp.lt.s32.totalorder %s43_s16, %s43_s16 }
  0x1b   :  { %p1782_p11 = scmp.ne.s32.totalorder %s43_s16, %s1781_s24  ;;  %p1787_p13 = scmp.lt.s32.totalorder %s1781_s24, %s1781_s24 }
  0x1d   :  { %p1788_p0 = por %p1787_p13, %p1786_p12 }
  0x1f   :  { %p1789_p1 = pnand %p1788_p0, %p1782_p11 }
  0x21   :  { %1792 = shalt.err (!%p1789_p1)
}
  0x22   :  { %48 = dma.hbm_to_vmem [thread:$0]  %s2158_s6, 256, %s43_s16, [#allocation6], %s1822_s11, %s1822_s11, %s1823_s12  }
  0x23   :  { %1815 = dma.done.wait [#allocation3], 256  }
  0x24   :  { %1816 = vsyncadd [#allocation3], 4294967040 }
  0x25   :  { %1817 = dma.done.wait [#allocation6], 256  }
  0x26   :  { %1818 = vsyncadd [#allocation6], 4294967040  ;;  %vm59_vm0 = vcmask 261120   ;;  %v1909_v0 = vld [vmem:[#allocation2] sm:$0xff]  ;;  %v1911_v1 = vld [vmem:[#allocation2 + $0x8] sm:$0xff]  ;;  %vm197_vm1 = vcmask 64512  }
  0x27   :  { %v60_v2 = vsel %vm59_vm0, %v1909_v0, 0.0  ;;  %v63_v3 = vsel %vm59_vm0, %v1911_v1, 0.0  ;;  %v99_v14 = vld [vmem:[%s2153_s1] sm:$0xff]  ;;  %v100_v15 = vld [vmem:[%s2153_s1 + $0x8] sm:$0xff]  ;;  %v101_v16 = vld [vmem:[%s2153_s1 + $0x10] sm:$0xff]  ;;  %s1825_s17 = smov 88  }
  0x28   :  { %61 = vadd.xlane.f32.xlu0 %v60_v2  ;;  %v1571_v17 = vpack.c.bf16 %v100_v15, %v99_v14  ;;  %v102_v18 = vld [vmem:[%s2153_s1 + $0x18] sm:$0xff]  ;;  %v1363_v27 = vld [vmem:[%s2157_s5] ss:$0 sm:$0xff]  ;;  %v1364_v29 = vld [vmem:[%s2157_s5 + $0x1] ss:$0 sm:$0xff]  ;;  %s1826_s18 = smov 96  }
  0x29   :  { %v1575_v19 = vpack.c.bf16 %v102_v18, %v101_v16  ;;  %v1365_v36 = vld [vmem:[%s2157_s5 + $0x2] ss:$0 sm:$0xff]  ;;  %s1827_s19 = smov 120   ;;  %vm1960_vm2 = vmpackc.low %vm197_vm1, %vm197_vm1  ;;  %v1976_v53 = vld [vmem:[#allocation5 + $0x8] sm:$0xff]  ;;  %vm281_vm3 = vcmask 130048   ;;  %s1828_s20 = smov 56  }
  0x2a   :  { %1572 = vmatprep.subr.bf16.mxu1 %v1571_v17  ;;  %v1978_v54 = vld [vmem:[#allocation5] sm:$0xff]  ;;  %s1829_s21 = smov 64   ;;  %s1830_s22 = smov 80   ;;  %vm1019_vm4 = vcmask 195584   ;;  %vm1259_vm5 = vcmask 523264  }
  0x2b   :  { %1574 = vmatpush3.bf16.msra.mxu1 %v1571_v17  ;;  %s1831_s23 = smov 112   ;;  %s1832_s24 = smov 48  }
  0x2c   :  { %64 = vadd.xlane.f32.xlu0 %v63_v3  ;;  %1576 = vmatprep.subr.bf16.mxu1 %v1575_v19  ;;  %s1833_s0 = smov 104   ;;  %s1834_s25 = smov 72  }
  0x2d   :  { %s1835_s6 = smov 40   ;;  %s1836_s26 = smov 16  }
  0x2e   :  { %s1837_s1 = smov 24  }
  0x2f   :  { %1578 = vmatpush3.bf16.msra.mxu1 %v1575_v19 }
  0xb5   :  { %v62_v4 = vpop.xlane.xlu0 %61 }
  0xb6   :  { %v67_v5 = vmul.f32 0.03125, %v62_v4 }
  0xb8   :  { %v69_v6 = vsub.f32 %v1909_v0, %v67_v5 }
  0xb9   :  { %v65_v7 = vpop.xlane.xlu0 %64 }
  0xba   :  { %v68_v8 = vmul.f32 0.03125, %v65_v7  ;;  %v71_v9 = vmul.f32 %v69_v6, %v69_v6 }
  0xbc   :  { %v70_v10 = vsub.f32 %v1911_v1, %v68_v8  ;;  %v73_v11 = vsel %vm59_vm0, %v71_v9, 0.0 }
  0xbd   :  { %74 = vadd.xlane.f32.xlu1 %v73_v11 }
  0xbe   :  { %v72_v12 = vmul.f32 %v70_v10, %v70_v10 }
  0xc0   :  { %v76_v13 = vsel %vm59_vm0, %v72_v12, 0.0 }
  0xc1   :  { %77 = vadd.xlane.f32.xlu1 %v76_v13 }
 0x14a   :  { %v75_v20 = vpop.xlane.xlu1 %74 }
 0x14b   :  { %v79_v21 = vmul.f32 0.03125, %v75_v20 }
 0x14d   :  { %v81_v22 = vadd.f32 1e-05, %v79_v21 }
 0x14e   :  { %v78_v23 = vpop.xlane.xlu1 %77 }
 0x14f   :  { %1709 = vrsqrt.f32 %v81_v22  ;;  %v80_v24 = vmul.f32 0.03125, %v78_v23 }
 0x151   :  { %v82_v25 = vadd.f32 1e-05, %v80_v24 }
 0x153   :  { %1711 = vrsqrt.f32 %v82_v25 }
 0x159   :  { %v1710_v26 = vpop.eup %1709 }
 0x15a   :  { %v85_v28 = vmul.f32 %v1710_v26, %v69_v6 }
 0x15c   :  { %v91_v30 = vmul.f32 %v1363_v27, %v85_v28 }
 0x15d   :  { %v1712_v31 = vpop.eup %1711 }
 0x15e   :  { %v86_v32 = vmul.f32 %v1712_v31, %v70_v10  ;;  %v97_v33 = vadd.f32 %v1364_v29, %v91_v30 }
 0x160   :  { %v92_v34 = vmul.f32 %v1363_v27, %v86_v32  ;;  %1471 = vmatprep.mubr.msk.f32.mxu1 %vm59_vm0, %v97_v33 }
 0x162   :  { %v98_v35 = vadd.f32 %v1364_v29, %v92_v34 }
 0x164   :  { %1472 = vmatmul.mubr.msk.f32.vlgmr.msra.gmra.mrb[0].mxu1 %vm59_vm0, %v98_v35 }
 0x237   :  { %v1473_v37 = vpop.f32.mrb[0].mxu1 }
 0x238   :  { %v1944_v38 = vadd.f32 %v1473_v37, %v1365_v36  ;;  %v180_v39 = vpop.f32.mrb[1].mxu1 }
 0x239   :  { %v1946_v40 = vadd.f32 %v1365_v36, %v180_v39 }
 0x23b   :  { %1478 = vmatprep.mubr.msk.f32.mxu1 %vm197_vm1, %v1946_v40  ;;  %v1952_v41 = vpack.i.bf16 %v1944_v38, %v1946_v40 }
 0x23d   :  { %1675 = vrot.lane.b32.xlu1 %v1952_v41, %s1825_s17  ;;  %1670 = vrot.lane.b32.xlu0 %v1952_v41, %s1826_s18 }
 0x241   :  { %391 = vrot.lane.b32.xlu1 %v1946_v40, %s1827_s19 }
 0x245   :  { %393 = vrot.lane.b32.xlu1 %v1944_v38, %s1827_s19 }
 0x2af   :  { %v1676_v42 = vpop.permute.xlu1 %1675  ;;  %v1671_v43 = vpop.permute.xlu0 %1670 }
 0x2b0   :  { %v1678_v44 = vunpack.i.h.bf16 %v1676_v42  ;;  %v1677_v45 = vunpack.i.l.bf16 %v1676_v42  ;;  %v1673_v46 = vunpack.i.h.bf16 %v1671_v43  ;;  %v1672_v47 = vunpack.i.l.bf16 %v1671_v43 }
 0x2b2   :  { %v1579_v49 = vpack.c.bf16 %v1673_v46, %v1672_v47  ;;  %v1589_v50 = vpack.c.bf16 %v1678_v44, %v1677_v45 }
 0x2b3   :  { %v392_v51 = vpop.permute.xlu1 %391 }
 0x2b4   :  { %1581 = vmatprep.subr.msk.bf16.mxu1 %vm1960_vm2, %v1579_v49 }
 0x2b5   :  { %1584 = vmatpush3.bf16.xpose.msk.msra.mxu1 %vm1960_vm2, %v1579_v49 }
 0x2b6   :  { %1591 = vmatprep.subr.msk.bf16.mxu1 %vm1960_vm2, %v1589_v50 }
 0x2b7   :  { %v394_v52 = vpop.permute.xlu1 %393 }
 0x2bc   :  { %1479 = vmatmul.mubr.msk.f32.vlgmr.msra.gmra.mrb[2].mxu1 %vm197_vm1, %v1944_v38 }
 0x2bd   :  { %1594 = vmatpush3.bf16.xpose.msk.msra.mxu1 %vm1960_vm2, %v1589_v50  ;;  %1492 = vmatprep.mubr.msk.f32.mxu1 %vm197_vm1, %v392_v51 }
 0x2c4   :  { %1493 = vmatmul.mubr.msk.f32.vlgmr.msra.gmra.mrb[4].mxu1 %vm197_vm1, %v394_v52 }
 0x38f   :  { %v1480_v55 = vpop.f32.mrb[2].mxu1 }
 0x390   :  { %v278_v56 = vadd.f32 %v1480_v55, %v1976_v53  ;;  %v272_v57 = vpop.f32.mrb[3].mxu1 }
 0x391   :  { %v273_v58 = vadd.f32 %v272_v57, %v1978_v54 }
 0x392   :  { %v285_v59 = vsel %vm281_vm3, %v278_v56, -inf }
 0x393   :  { %286 = vmax.xlane.f32.xlu1 %v285_v59  ;;  %v282_v60 = vsel %vm281_vm3, %v273_v58, -inf }
 0x394   :  { %283 = vmax.xlane.f32.xlu0 %v282_v60 }
 0x397   :  { %v1494_v61 = vpop.f32.mrb[4].mxu1 }
 0x398   :  { %v473_v62 = vpop.f32.mrb[5].mxu1  ;;  %v479_v2 = vadd.f32 %v1494_v61, %v1976_v53 }
 0x399   :  { %v474_v63 = vadd.f32 %v473_v62, %v1978_v54 }
 0x39a   :  { %v485_v4 = vsel %vm281_vm3, %v479_v2, -inf }
 0x39b   :  { %v482_v3 = vsel %vm281_vm3, %v474_v63, -inf }
 0x39c   :  { %483 = vmax.xlane.f32.xlu0 %v482_v3 }
 0x3a0   :  { %486 = vmax.xlane.f32.xlu0 %v485_v4 }
 0x420   :  { %v287_v5 = vpop.xlane.xlu1 %286 }
 0x421   :  { %v289_v6 = vsub.f32 %v278_v56, %v287_v5  ;;  %v284_v7 = vpop.xlane.xlu0 %283 }
 0x422   :  { %v288_v8 = vsub.f32 %v273_v58, %v284_v7 }
 0x423   :  { %v292_v9 = vmul.f32 1.442695, %v289_v6 }
 0x424   :  { %v290_v10 = vmul.f32 1.442695, %v288_v8 }
 0x425   :  { %1713 = vpow2.f32 %v292_v9 }
 0x426   :  { %1715 = vpow2.f32 %v290_v10 }
 0x429   :  { %v484_v11 = vpop.xlane.xlu0 %483 }
 0x42a   :  { %v488_v12 = vsub.f32 %v474_v63, %v484_v11 }
 0x42c   :  { %v490_v13 = vmul.f32 1.442695, %v488_v12 }
 0x42d   :  { %v487_v14 = vpop.xlane.xlu0 %486 }
 0x42e   :  { %1717 = vpow2.f32 %v490_v13  ;;  %v489_v15 = vsub.f32 %v479_v2, %v487_v14 }
 0x42f   :  { %v1714_v16 = vpop.eup %1713 }
 0x430   :  { %v1716_v17 = vpop.eup %1715  ;;  %v492_v18 = vmul.f32 1.442695, %v489_v15  ;;  %v297_v19 = vsel %vm281_vm3, %v1714_v16, 0.0 }
 0x431   :  { %298 = vadd.xlane.f32.xlu1 %v297_v19  ;;  %v294_v20 = vsel %vm281_vm3, %v1716_v17, 0.0 }
 0x432   :  { %1719 = vpow2.f32 %v492_v18  ;;  %295 = vadd.xlane.f32.xlu0 %v294_v20 }
 0x438   :  { %v1718_v21 = vpop.eup %1717 }
 0x439   :  { %v494_v22 = vsel %vm281_vm3, %v1718_v21, 0.0 }
 0x43a   :  { %495 = vadd.xlane.f32.xlu0 %v494_v22 }
 0x43c   :  { %v1720_v23 = vpop.eup %1719 }
 0x43d   :  { %v497_v24 = vsel %vm281_vm3, %v1720_v23, 0.0 }
 0x43e   :  { %498 = vadd.xlane.f32.xlu1 %v497_v24 }
 0x44f   :  { %1685 = vrot.lane.b32.xlu1 %v1952_v41, %s1828_s20 }
 0x450   :  { %1680 = vrot.lane.b32.xlu0 %v1952_v41, %s1829_s21 }
 0x453   :  { %1690 = vrot.lane.b32.xlu1 %v1952_v41, %s1830_s22 }
 0x454   :  { %593 = vrot.lane.b32.xlu0 %v1944_v38, %s1831_s23 }
 0x457   :  { %591 = vrot.lane.b32.xlu1 %v1946_v40, %s1831_s23 }
 0x4be   :  { %v299_v26 = vpop.xlane.xlu1 %298 }
 0x4bf   :  { %v296_v25 = vpop.xlane.xlu0 %295 }
 0x4c0   :  { %1721 = vrcp.f32 %v296_v25 }
 0x4c1   :  { %1723 = vrcp.f32 %v299_v26 }
 0x4c7   :  { %v496_v27 = vpop.xlane.xlu0 %495 }
 0x4c8   :  { %1725 = vrcp.f32 %v496_v27 }
 0x4ca   :  { %v1722_v28 = vpop.eup %1721 }
 0x4cb   :  { %v499_v29 = vpop.xlane.xlu1 %498  ;;  %v1681_v30 = vpop.permute.xlu0 %1680  ;;  %v302_v31 = vmul.f32 %v1722_v28, %v1716_v17 }
 0x4cc   :  { %1727 = vrcp.f32 %v499_v29  ;;  %v1683_v32 = vunpack.i.h.bf16 %v1681_v30  ;;  %v1682_v33 = vunpack.i.l.bf16 %v1681_v30  ;;  %v1724_v35 = vpop.eup %1723 }
 0x4cd   :  { %1485 = vmatprep.mubr.msk.f32.mxu0 %vm281_vm3, %v302_v31  ;;  %v303_v44 = vmul.f32 %v1724_v35, %v1714_v16 }
 0x4ce   :  { %v1585_v34 = vpack.c.bf16 %v1683_v32, %v1682_v33 }
 0x4cf   :  { %v1686_v36 = vpop.permute.xlu1 %1685  ;;  %v594_v56 = vpop.permute.xlu0 %593 }
 0x4d0   :  { %v1688_v37 = vunpack.i.h.bf16 %v1686_v36  ;;  %v1687_v39 = vunpack.i.l.bf16 %v1686_v36  ;;  %1586 = vmatprep.subr.bf16.mxu0 %v1585_v34 }
 0x4d1   :  { %1588 = vmatpush3.bf16.msra.mxu0 %v1585_v34 }
 0x4d2   :  { %v1726_v42 = vpop.eup %1725  ;;  %v1595_v43 = vpack.c.bf16 %v1688_v37, %v1687_v39 }
 0x4d3   :  { %v1691_v45 = vpop.permute.xlu1 %1690  ;;  %v502_v46 = vmul.f32 %v1726_v42, %v1718_v21 }
 0x4d4   :  { %v1693_v47 = vunpack.i.h.bf16 %v1691_v45  ;;  %v1692_v49 = vunpack.i.l.bf16 %v1691_v45  ;;  %1486 = vmatmul.mubr.msk.f32.vlgmr.msra.gmra.mrb[0].mxu0 %vm281_vm3, %v303_v44  ;;  %1596 = vmatprep.subr.bf16.mxu0 %v1595_v43 }
 0x4d5   :  { %1598 = vmatpush3.bf16.msra.mxu0 %v1595_v43  ;;  %1499 = vmatprep.mubr.msk.f32.mxu0 %vm281_vm3, %v502_v46 }
 0x4d6   :  { %v1728_v50 = vpop.eup %1727  ;;  %v1599_v51 = vpack.c.bf16 %v1693_v47, %v1692_v49 }
 0x4d7   :  { %v503_v52 = vmul.f32 %v1728_v50, %v1720_v23  ;;  %v592_v55 = vpop.permute.xlu1 %591 }
 0x4d8   :  { %1601 = vmatprep.subr.msk.bf16.mxu0 %vm1960_vm2, %v1599_v51 }
 0x4d9   :  { %1500 = vmatmul.mubr.msk.f32.vlgmr.msra.gmra.mrb[2].mxu0 %vm281_vm3, %v503_v52 }
 0x4da   :  { %1506 = vmatprep.mubr.msk.f32.mxu0 %vm197_vm1, %v592_v55 }
 0x4de   :  { %1604 = vmatpush3.bf16.xpose.msk.msra.mxu0 %vm1960_vm2, %v1599_v51 }
 0x4e5   :  { %1507 = vmatmul.mubr.msk.f32.vlgmr.msra.gmra.mrb[4].mxu0 %vm197_vm1, %v594_v56 }
 0x5a7   :  { %v2007_v57 = vpop.f32.mrb[0].mxu0 }
 0x5a8   :  { %v2009_v58 = vpop.f32.mrb[1].mxu0 }
 0x5ac   :  { %v2011_v59 = vpop.f32.mrb[2].mxu0 }
 0x5ad   :  { %v2013_v60 = vpop.f32.mrb[3].mxu0 }
 0x5b8   :  { %v1508_v61 = vpop.f32.mrb[4].mxu0 }
 0x5b9   :  { %v679_v62 = vadd.f32 %v1508_v61, %v1976_v53  ;;  %v673_v63 = vpop.f32.mrb[5].mxu0 }
 0x5ba   :  { %v674_v2 = vadd.f32 %v673_v63, %v1978_v54  ;;  %v1024_v63 = vld [vmem:[%s2154_s2 + $0x10] sm:$0xff] }
 0x5bb   :  { %v685_v3 = vsel %vm281_vm3, %v679_v62, -inf }
 0x5bc   :  { %686 = vmax.xlane.f32.xlu0 %v685_v3  ;;  %v682_v4 = vsel %vm281_vm3, %v674_v2, -inf  ;;  %v1025_v3 = vld [vmem:[%s2154_s2 + $0x18] sm:$0xff] }
 0x5bd   :  { %683 = vmax.xlane.f32.xlu1 %v682_v4  ;;  %v1623_v4 = vpack.c.bf16 %v1025_v3, %v1024_v63 }
 0x5ce   :  { %1695 = vrot.lane.b32.xlu1 %v1952_v41, %s1832_s24 }
 0x5d2   :  { %791 = vrot.lane.b32.xlu1 %v1946_v40, %s1833_s0 }
 0x5d6   :  { %793 = vrot.lane.b32.xlu1 %v1944_v38, %s1833_s0 }
 0x649   :  { %v687_v5 = vpop.xlane.xlu0 %686 }
 0x64a   :  { %v689_v6 = vsub.f32 %v679_v62, %v687_v5  ;;  %v684_v7 = vpop.xlane.xlu1 %683  ;;  %v1022_v62 = vld [vmem:[%s2154_s2] sm:$0xff] }
 0x64b   :  { %v688_v8 = vsub.f32 %v674_v2, %v684_v7 }
 0x64c   :  { %v692_v9 = vmul.f32 1.442695, %v689_v6 }
 0x64d   :  { %v690_v10 = vmul.f32 1.442695, %v688_v8 }
 0x64e   :  { %1729 = vpow2.f32 %v692_v9  ;;  %v1696_v11 = vpop.permute.xlu1 %1695 }
 0x64f   :  { %v1698_v12 = vunpack.i.h.bf16 %v1696_v11  ;;  %v1697_v13 = vunpack.i.l.bf16 %v1696_v11  ;;  %1731 = vpow2.f32 %v690_v10 }
 0x651   :  { %v1605_v14 = vpack.c.bf16 %v1698_v12, %v1697_v13 }
 0x652   :  { %v792_v27 = vpop.permute.xlu1 %791 }
 0x653   :  { %1606 = vmatprep.subr.bf16.mxu1 %v1605_v14 }
 0x654   :  { %1608 = vmatpush3.bf16.msra.mxu1 %v1605_v14 }
 0x656   :  { %v794_v28 = vpop.permute.xlu1 %793 }
 0x658   :  { %v1730_v15 = vpop.eup %1729 }
 0x659   :  { %v697_v16 = vsel %vm281_vm3, %v1730_v15, 0.0  ;;  %v1732_v40 = vpop.eup %1731 }
 0x65a   :  { %698 = vadd.xlane.f32.xlu0 %v697_v16  ;;  %v694_v38 = vsel %vm281_vm3, %v1732_v40, 0.0 }
 0x65e   :  { %695 = vadd.xlane.f32.xlu0 %v694_v38 }
 0x674   :  { %1700 = vrot.lane.b32.xlu0 %v1952_v41, %s1834_s25 }
 0x6e7   :  { %v699_v17 = vpop.xlane.xlu0 %698 }
 0x6e8   :  { %1733 = vrcp.f32 %v699_v17 }
 0x6eb   :  { %v696_v18 = vpop.xlane.xlu0 %695 }
 0x6ec   :  { %1735 = vrcp.f32 %v696_v18 }
 0x6ef   :  { %v1701_v19 = vpop.permute.xlu0 %1700 }
 0x6f0   :  { %v1703_v20 = vunpack.i.h.bf16 %v1701_v19  ;;  %v1702_v21 = vunpack.i.l.bf16 %v1701_v19 }
 0x6f2   :  { %v1609_v22 = vpack.c.bf16 %v1703_v20, %v1702_v21  ;;  %v1734_v23 = vpop.eup %1733 }
 0x6f3   :  { %v703_v26 = vmul.f32 %v1734_v23, %v1730_v15 }
 0x6f4   :  { %1611 = vmatprep.subr.msk.bf16.mxu1 %vm1960_vm2, %v1609_v22 }
 0x6f6   :  { %v1736_v24 = vpop.eup %1735 }
 0x6f7   :  { %v702_v25 = vmul.f32 %v1736_v24, %v1732_v40 }
 0x6f9   :  { %1513 = vmatprep.mubr.msk.f32.mxu1 %vm281_vm3, %v702_v25 }
 0x6fa   :  { %1514 = vmatmul.mubr.msk.f32.vlgmr.msra.gmra.mrb[6].mxu1 %vm281_vm3, %v703_v26 }
 0x6fb   :  { %1614 = vmatpush3.bf16.xpose.msk.msra.mxu1 %vm1960_vm2, %v1609_v22  ;;  %1520 = vmatprep.mubr.msk.f32.mxu1 %vm197_vm1, %v792_v27 }
 0x702   :  { %1521 = vmatmul.mubr.msk.f32.vlgmr.msra.gmra.mrb[8].mxu1 %vm197_vm1, %v794_v28 }
 0x7cd   :  { %v1515_v29 = vpop.f32.mrb[6].mxu1 }
 0x7ce   :  { %v782_v30 = vpop.f32.mrb[7].mxu1 }
 0x7d5   :  { %v1522_v31 = vpop.f32.mrb[8].mxu1 }
 0x7d6   :  { %v879_v32 = vadd.f32 %v1522_v31, %v1976_v53  ;;  %v873_v33 = vpop.f32.mrb[9].mxu1 }
 0x7d7   :  { %v874_v34 = vadd.f32 %v873_v33, %v1978_v54  ;;  %v1155_v33 = vld [vmem:[%s2155_s3 + $0x8] sm:$0xff] }
 0x7d8   :  { %v885_v35 = vsel %vm281_vm3, %v879_v32, -inf }
 0x7d9   :  { %886 = vmax.xlane.f32.xlu0 %v885_v35  ;;  %v882_v36 = vsel %vm281_vm3, %v874_v34, -inf  ;;  %v1156_v35 = vld [vmem:[%s2155_s3 + $0x10] sm:$0xff] }
 0x7da   :  { %883 = vmax.xlane.f32.xlu1 %v882_v36  ;;  %v1157_v36 = vld [vmem:[%s2155_s3 + $0x18] sm:$0xff] }
 0x7eb   :  { %1705 = vrot.lane.b32.xlu1 %v1952_v41, %s1835_s6 }
 0x7ef   :  { %995 = vrot.lane.b32.xlu1 %v2011_v59, %s1823_s12 }
 0x7f3   :  { %1001 = vrot.lane.b32.xlu1 %v782_v30, %s1836_s26 }
 0x7f7   :  { %1003 = vrot.lane.b32.xlu1 %v1515_v29, %s1836_s26 }
 0x866   :  { %v887_v48 = vpop.xlane.xlu0 %886 }
 0x867   :  { %v889_v53 = vsub.f32 %v879_v32, %v887_v48  ;;  %v884_v37 = vpop.xlane.xlu1 %883  ;;  %v1154_v32 = vld [vmem:[%s2155_s3] sm:$0xff]  ;;  %v1631_v48 = vpack.c.bf16 %v1157_v36, %v1156_v35 }
 0x868   :  { %v888_v39 = vsub.f32 %v874_v34, %v884_v37  ;;  %v1627_v34 = vpack.c.bf16 %v1155_v33, %v1154_v32  ;;  %v1247_v37 = vld [vmem:[%s2156_s4 + $0x8] sm:$0xff] }
 0x869   :  { %v892_v54 = vmul.f32 1.442695, %v889_v53  ;;  %v1246_v53 = vld [vmem:[%s2156_s4] sm:$0xff] }
 0x86a   :  { %v890_v42 = vmul.f32 1.442695, %v888_v39  ;;  %1628 = vmatprep.subr.bf16.mxu1 %v1627_v34  ;;  %v1248_v39 = vld [vmem:[%s2156_s4 + $0x10] sm:$0xff] }
 0x86b   :  { %v1706_v43 = vpop.permute.xlu1 %1705  ;;  %1630 = vmatpush3.bf16.msra.mxu1 %v1627_v34 }
 0x86c   :  { %1737 = vpow2.f32 %v890_v42  ;;  %v1708_v44 = vunpack.i.h.bf16 %v1706_v43  ;;  %v1707_v45 = vunpack.i.l.bf16 %v1706_v43  ;;  %1632 = vmatprep.subr.bf16.mxu1 %v1631_v48  ;;  %v1249_v42 = vld [vmem:[%s2156_s4 + $0x18] sm:$0xff] }
 0x86d   :  { %1739 = vpow2.f32 %v892_v54  ;;  %v1635_v54 = vpack.c.bf16 %v1247_v37, %v1246_v53  ;;  %v1639_v43 = vpack.c.bf16 %v1249_v42, %v1248_v39 }
 0x86e   :  { %v1615_v46 = vpack.c.bf16 %v1708_v44, %v1707_v45  ;;  %v1250_v44 = vld [vmem:[%s2156_s4 + $0x20] sm:$0xff]  ;;  %v1251_v45 = vld [vmem:[%s2156_s4 + $0x28] sm:$0xff] }
 0x86f   :  { %v996_v7 = vpop.permute.xlu1 %995  ;;  %1634 = vmatpush3.bf16.msra.mxu1 %v1631_v48 }
 0x870   :  { %1616 = vmatprep.subr.bf16.mxu0 %v1615_v46  ;;  %v1016_v13 = vsel %vm197_vm1, %v2007_v57, %v996_v7 }
 0x871   :  { %1618 = vmatpush3.bf16.msra.mxu0 %v1615_v46  ;;  %v1643_v46 = vpack.c.bf16 %v1251_v45, %v1250_v44 }
 0x873   :  { %v1002_v8 = vpop.permute.xlu1 %1001 }
 0x876   :  { %v1738_v41 = vpop.eup %1737 }
 0x877   :  { %v894_v47 = vsel %vm281_vm3, %v1738_v41, 0.0  ;;  %v1740_v49 = vpop.eup %1739  ;;  %v1004_v10 = vpop.permute.xlu1 %1003 }
 0x878   :  { %895 = vadd.xlane.f32.xlu0 %v894_v47  ;;  %v897_v50 = vsel %vm281_vm3, %v1740_v49, 0.0  ;;  %v1018_v16 = vsel %vm281_vm3, %v1016_v13, %v1004_v10 }
 0x87c   :  { %898 = vadd.xlane.f32.xlu0 %v897_v50 }
 0x892   :  { %993 = vrot.lane.b32.xlu0 %v2013_v60, %s1823_s12  ;;  %v1023_v60 = vld [vmem:[%s2154_s2 + $0x8] sm:$0xff] }
 0x893   :  { %v1619_v2 = vpack.c.bf16 %v1023_v60, %v1022_v62 }
 0x895   :  { %1620 = vmatprep.subr.bf16.mxu0 %v1619_v2 }
 0x905   :  { %v896_v51 = vpop.xlane.xlu0 %895 }
 0x906   :  { %1741 = vrcp.f32 %v896_v51 }
 0x909   :  { %v899_v52 = vpop.xlane.xlu0 %898 }
 0x90a   :  { %1743 = vrcp.f32 %v899_v52 }
 0x90d   :  { %v994_v9 = vpop.permute.xlu0 %993 }
 0x90e   :  { %v1015_v11 = vsel %vm197_vm1, %v2009_v58, %v994_v9  ;;  %v1392_v58 = vld [vmem:[%s2157_s5 + $0x3] ss:$0 sm:$0xff] }
 0x90f   :  { %v1017_v14 = vsel %vm281_vm3, %v1015_v11, %v1002_v8  ;;  %v1397_v8 = vld [vmem:[%s2157_s5 + $0x6] ss:$0 sm:$0xff] }
 0x910   :  { %v1742_v55 = vpop.eup %1741 }
 0x911   :  { %v902_v56 = vmul.f32 %v1742_v55, %v1738_v41 }
 0x913   :  { %1527 = vmatprep.mubr.msk.f32.mxu0 %vm281_vm3, %v902_v56  ;;  %v1395_v56 = vld [vmem:[%s2157_s5 + $0x4] ss:$0 sm:$0xff] }
 0x914   :  { %v1744_v59 = vpop.eup %1743 }
 0x915   :  { %v903_v61 = vmul.f32 %v1744_v59, %v1740_v49 }
 0x917   :  { %1528 = vmatmul.mubr.msk.f32.vlgmr.msra.gmra.mrb[6].mxu0 %vm281_vm3, %v903_v61  ;;  %v1396_v61 = vld [vmem:[%s2157_s5 + $0x5] ss:$0 sm:$0xff] }
 0x918   :  { %1622 = vmatpush3.bf16.msra.mxu0 %v1619_v2 }
 0x919   :  { %1624 = vmatprep.subr.bf16.mxu0 %v1623_v4 }
 0x91c   :  { %1626 = vmatpush3.bf16.msra.mxu0 %v1623_v4 }
 0x91d   :  { %1636 = vmatprep.subr.bf16.mxu0 %v1635_v54 }
 0x9ea   :  { %v1529_v5 = vpop.f32.mrb[6].mxu0 }
 0x9eb   :  { %1011 = vrot.lane.b32.xlu1 %v1529_v5, %s1837_s1  ;;  %v982_v6 = vpop.f32.mrb[7].mxu0  ;;  %v1252_v5 = vld [vmem:[%s2156_s4 + $0x30] sm:$0xff] }
 0x9ec   :  { %1009 = vrot.lane.b32.xlu0 %v982_v6, %s1837_s1  ;;  %v1253_v6 = vld [vmem:[%s2156_s4 + $0x38] sm:$0xff]  ;;  %s1838_s4 = smov [#allocation7]  }
 0x9ed   :  { %v1647_v7 = vpack.c.bf16 %v1253_v6, %v1252_v5  ;;  %s1350_s21 = sshll.u32 %s1838_s4, 4  ;;  %s1351_s21 = int_to_ptr.vmem [resolvable:$true] %s1350_s21 }
 0x9ee   :  { %s1793_s22 = scalar_lea.vmem %s1351_s21, 256  ;;  %p1798_p3 = scmp.lt.s32.totalorder %s1351_s21, %s1351_s21 }
 0x9ef   :  { %p1794_p2 = scmp.ne.s32.totalorder %s1351_s21, %s1793_s22  ;;  %p1799_p4 = scmp.lt.s32.totalorder %s1793_s22, %s1793_s22 }
 0x9f1   :  { %p1800_p5 = por %p1799_p4, %p1798_p3 }
 0x9f3   :  { %p1801_p6 = pnand %p1800_p5, %p1794_p2 }
 0xa5d   :  { %v1012_v12 = vpop.permute.xlu1 %1011 }
 0xa5e   :  { %v1010_v15 = vpop.permute.xlu0 %1009  ;;  %v1021_v38 = vsel %vm1019_vm4, %v1018_v16, %v1012_v12 }
 0xa5f   :  { %v1020_v40 = vsel %vm1019_vm4, %v1017_v14, %v1010_v15  ;;  %v1400_v15 = vld [vmem:[%s2157_s5 + $0x7] ss:$0 sm:$0xff] }
 0xa60   :  { %1538 = vmatprep.mubr.msk.f32.mxu0 %vm59_vm0, %v1020_v40 }
 0xa61   :  { %1539 = vmatmul.mubr.msk.f32.vlgmr.msra.gmra.mrb[8].mxu0 %vm59_vm0, %v1021_v38 }
 0xa62   :  { %1638 = vmatpush3.bf16.msra.mxu0 %v1635_v54 }
 0xa63   :  { %1640 = vmatprep.subr.bf16.mxu0 %v1639_v43 }
 0xa66   :  { %1642 = vmatpush3.bf16.msra.mxu0 %v1639_v43 }
 0xa67   :  { %1644 = vmatprep.subr.bf16.mxu0 %v1643_v46 }
 0xa6a   :  { %1646 = vmatpush3.bf16.msra.mxu0 %v1643_v46 }
 0xa6b   :  { %1648 = vmatprep.subr.bf16.mxu0 %v1647_v7 }
 0xa6e   :  { %1650 = vmatpush3.bf16.msra.mxu0 %v1647_v7 }
 0xb34   :  { %v1540_v17 = vpop.f32.mrb[8].mxu0 }
 0xb35   :  { %v1109_v18 = vadd.f32 %v1540_v17, %v1392_v58  ;;  %v1103_v19 = vpop.f32.mrb[9].mxu0 }
 0xb36   :  { %v1104_v20 = vadd.f32 %v1392_v58, %v1103_v19 }
 0xb37   :  { %v2070_v57 = vadd.f32 %v1109_v18, %v1911_v1 }
 0xb38   :  { %v2073_v21 = vadd.f32 %v1104_v20, %v1909_v0 }
 0xb39   :  { %v1119_v22 = vsel %vm59_vm0, %v2070_v57, 0.0 }
 0xb3a   :  { %1120 = vadd.xlane.f32.xlu1 %v1119_v22  ;;  %v1116_v23 = vsel %vm59_vm0, %v2073_v21, 0.0 }
 0xb3b   :  { %1117 = vadd.xlane.f32.xlu0 %v1116_v23 }
 0xbc7   :  { %v1121_v24 = vpop.xlane.xlu1 %1120 }
 0xbc8   :  { %v1123_v25 = vmul.f32 0.03125, %v1121_v24  ;;  %v1118_v26 = vpop.xlane.xlu0 %1117 }
 0xbc9   :  { %v1122_v27 = vmul.f32 0.03125, %v1118_v26 }
 0xbca   :  { %v1125_v28 = vsub.f32 %v2070_v57, %v1123_v25 }
 0xbcb   :  { %v1124_v1 = vsub.f32 %v2073_v21, %v1122_v27 }
 0xbcc   :  { %v1127_v30 = vmul.f32 %v1125_v28, %v1125_v28 }
 0xbcd   :  { %v1126_v29 = vmul.f32 %v1124_v1, %v1124_v1 }
 0xbce   :  { %v1131_v31 = vsel %vm59_vm0, %v1127_v30, 0.0 }
 0xbcf   :  { %v1128_v0 = vsel %vm59_vm0, %v1126_v29, 0.0 }
 0xbd0   :  { %1129 = vadd.xlane.f32.xlu0 %v1128_v0 }
 0xbd4   :  { %1132 = vadd.xlane.f32.xlu0 %v1131_v31 }
 0xc5d   :  { %v1130_v41 = vpop.xlane.xlu0 %1129 }
 0xc5e   :  { %v1134_v47 = vmul.f32 0.03125, %v1130_v41 }
 0xc60   :  { %v1136_v49 = vadd.f32 1e-05, %v1134_v47 }
 0xc61   :  { %v1133_v50 = vpop.xlane.xlu0 %1132 }
 0xc62   :  { %1745 = vrsqrt.f32 %v1136_v49  ;;  %v1135_v51 = vmul.f32 0.03125, %v1133_v50 }
 0xc64   :  { %v1137_v52 = vadd.f32 1e-05, %v1135_v51 }
 0xc66   :  { %1747 = vrsqrt.f32 %v1137_v52 }
 0xc6c   :  { %v1746_v55 = vpop.eup %1745 }
 0xc6d   :  { %v1140_v59 = vmul.f32 %v1746_v55, %v1124_v1 }
 0xc6f   :  { %v1146_v62 = vmul.f32 %v1395_v56, %v1140_v59 }
 0xc70   :  { %v1748_v60 = vpop.eup %1747 }
 0xc71   :  { %v1141_v63 = vmul.f32 %v1748_v60, %v1125_v28  ;;  %v1152_v2 = vadd.f32 %v1396_v61, %v1146_v62 }
 0xc73   :  { %v1147_v3 = vmul.f32 %v1395_v56, %v1141_v63  ;;  %1549 = vmatprep.mubr.msk.f32.mxu1 %vm59_vm0, %v1152_v2 }
 0xc75   :  { %v1153_v4 = vadd.f32 %v1396_v61, %v1147_v3 }
 0xc77   :  { %1550 = vmatmul.mubr.msk.f32.vlgmr.msra.gmra.mrb[10].mxu1 %vm59_vm0, %v1153_v4 }
 0xd4a   :  { %v1551_v9 = vpop.f32.mrb[10].mxu1 }
 0xd4b   :  { %v1241_v10 = vadd.f32 %v1551_v9, %v1397_v8  ;;  %v1235_v11 = vpop.f32.mrb[11].mxu1 }
 0xd4c   :  { %v1236_v12 = vadd.f32 %v1397_v8, %v1235_v11 }
 0xd4d   :  { %v1245_v14 = vmax.f32 %v1241_v10, 0.0 }
 0xd4e   :  { %v1244_v13 = vmax.f32 %v1236_v12, 0.0 }
 0xd50   :  { %1568 = vmatprep.mubr.msk.f32.mxu0 %vm1259_vm5, %v1244_v13 }
 0xd51   :  { %1569 = vmatmul.mubr.msk.f32.vlgmr.msra.gmra.mrb[10].mxu0 %vm1259_vm5, %v1245_v14 }
 0xe24   :  { %v1570_v16 = vpop.f32.mrb[10].mxu0 }
 0xe25   :  { %v1338_v40 = vadd.f32 %v1570_v16, %v1400_v15  ;;  %v1332_v38 = vpop.f32.mrb[11].mxu0 }
 0xe26   :  { %v1333_v58 = vadd.f32 %v1400_v15, %v1332_v38 }
 0xe27   :  { %v1342_v17 = vadd.f32 %v1338_v40, %v2070_v57 }
 0xe28   :  { %v1341_v18 = vadd.f32 %v1333_v58, %v2073_v21 }
 0xe29   :  { %1344 = vst.msk [vmem:[#allocation7 + $0x8] sm:$0xff] %vm59_vm0, %v1342_v17 }
 0xe2a   :  { %1343 = vst.msk [vmem:[#allocation7] sm:$0xff] %vm59_vm0, %v1341_v18 }
 0xe2b   :  { %1804 = shalt.err (!%p1801_p6)
}
 0xe2c   :  { %s1805_s24 = scalar_lea.hbm %s2159_s7, 256 }
 0xe2d   :  { %p1806_p7 = scmp.ne.s32.totalorder %s2159_s7, %s1805_s24  ;;  %p1809_p8 = scmp.lt.u32.totalorder %s1805_s24, %s2159_s7 }
 0xe2f   :  { %p1811_p9 = pnand %p1809_p8, %p1806_p7 }
 0xe31   :  { %1814 = shalt.err (!%p1811_p9)
}
 0xe32   :  { %1356 = dma.vmem_to_hbm [thread:$0]  %s1351_s21, 256, %s2159_s7, [#allocation4], %s1822_s11, %s1822_s11, %s1823_s12  }
 0xe33   :  { %1819 = dma.done.wait [#allocation4], 256  }
 0xe34   :  { %1820 = vsyncadd [#allocation4], 4294967040 }
 0xe35   :  { %1360 = vsyncpa [#allocation3], 1 }
 0xe36   :  { %1361 = vsyncpa [#allocation6], 1 }
 0xe37   :  { %1362 = vsyncpa [#allocation4], 1 }

</bundles_post_ra>
